<compile_context>
chip_gen: v6e
topology: v6e:2x2x1
jax: 0.10.0
libtpu: 0.0.40
codegen_flags: <defaults>
</compile_context>

<pallas_src>
import functools

import jax
import jax.numpy as jnp
from jax.experimental import pallas as pl
from jax.experimental.pallas import tpu as pltpu


# ----------------------------------------------------------------------------
# Kernel 1: fused embed + dense + tanh + masked mean pool
#   ids: (TB*L, 1) i32, mask: (TB, L) f32, emb: (V, D) bf16, w: (D, D) bf16,
#   b: (1, D) f32  ->  out: (TB, D) f32
#   out[r] = sum_l mask[r,l] * tanh(emb[id[r,l]] @ w + b) / sum_l mask[r,l]
# ----------------------------------------------------------------------------
def _encode_pool_kernel(tok_ref, m_ref, emb_ref, w_ref, b_ref, o_ref):
    ids = tok_ref[...]                       # (tb*L, 1) int32
    msk = m_ref[...]                         # (tb, L)   f32
    emb = emb_ref[...]                       # (V, D)    bf16, VMEM-resident across steps
    w = w_ref[...]                           # (D, D)    bf16, VMEM-resident across steps
    bias = b_ref[...]                        # (1, D)    f32
    tb, l = msk.shape
    v, d = emb.shape

    # In-kernel embedding gather as a one-hot MXU matmul: only token-id bytes (not the
    # (tb, L, D) activation slab) travel HBM -> VMEM per step.
    cols = jax.lax.broadcasted_iota(jnp.int32, (tb * l, v), 1)
    onehot = (ids == cols).astype(jnp.float32).astype(jnp.bfloat16)   # (tb*L, V)
    e = jnp.dot(onehot, emb, preferred_element_type=jnp.float32)      # (tb*L, D) f32

    # Token-wise dense projection: bf16 MXU inputs, f32 accumulation.
    h = jnp.dot(e.astype(jnp.bfloat16), w, preferred_element_type=jnp.float32)
    # Elementwise kept in f32 (v5e has no bf16 VPU/EUP).
    h = jnp.tanh(h + bias)                                            # (tb*L, D) f32

    # Masked mean pool on the VPU/XLU (frees the MXU slot for the next tile's matmuls).
    hm = h.reshape(tb, l, d) * msk[:, :, None]
    num = jnp.sum(hm, axis=1)                                         # (tb, D)
    # Clamp: an all-padding row yields 0 instead of the NaN PyTorch would produce.
    den = jnp.maximum(jnp.sum(msk, axis=1, keepdims=True), 1.0)       # (tb, 1)
    o_ref[...] = num / den                                            # exact divide (parity)


def _vmem_budget_bytes():
    """Generation-aware per-step VMEM cap (~3/4 of physical, bounded to [16, 96] MiB):
    v7x has 64 MiB physical where v5e/v6e have 128 MiB."""
    try:
        cap = int(getattr(pltpu.get_tpu_info(), "vmem_capacity_bytes", 64 << 20))
    except Exception:  # pragma: no cover - conservative fallback off-TPU
        cap = 64 << 20
    return max(16 << 20, min((cap * 3) // 4, 96 << 20))


def _pick_row_tile(bb, l, d, vocab, budget_bytes):
    """Largest row tile tb that (a) divides bb, (b) is a multiple of 8, (c) keeps the
    grid >= 2 steps when possible (so 'parallel' can shard across v7x's 2 TensorCores),
    and (d) whose full per-step footprint — double-buffered {ids, mask, out} blocks +
    resident emb/w/b + one-hot / activation intermediates — fits the VMEM budget."""
    resident = vocab * d * 2 + d * d * 2 + d * 4                 # emb + w (bf16) + bias

    def fits(tb):
        io = 2 * (tb * l * 4 + tb * l * 4 + tb * d * 4)          # 2x-buffered in/out blocks
        inter = tb * l * vocab * 4 + 2 * tb * l * d * 4          # one-hot + e + h (f32)
        return resident + io + inter <= budget_bytes

    upper = bb // 2 if bb >= 16 else bb
    best = None
    for tb in range(8, upper + 1, 8):
        if bb % tb == 0 and fits(tb):
            best = tb
    if best is None:
        best = 8 if bb % 8 == 0 else bb
    return best


def encode_and_pool(tokens, mask, emb, w, b, row_tile=None):
    bb, l = tokens.shape
    v, d = emb.shape
    budget = _vmem_budget_bytes()
    tb = row_tile if row_tile is not None else _pick_row_tile(bb, l, d, v, budget)
    assert bb % tb == 0, (bb, tb)

    ids = tokens.reshape(bb * l, 1).astype(jnp.int32)            # flat ids: 2-D kernel math
    cost = pl.CostEstimate(
        flops=2 * bb * l * (v * d + d * d) + 2 * bb * l * d,
        transcendentals=bb * l * d,
        bytes_accessed=8 * bb * l + 2 * (v * d + d * d) + 4 * d + 4 * bb * d)
    return pl.pallas_call(
        _encode_pool_kernel,
        out_shape=jax.ShapeDtypeStruct((bb, d), jnp.float32),
        grid=(bb // tb,),
        in_specs=[
            pl.BlockSpec((tb * l, 1), lambda i: (i, 0)),          # token ids
            pl.BlockSpec((tb, l), lambda i: (i, 0)),              # mask
            pl.BlockSpec((v, d), lambda i: (0, 0)),               # emb table (bf16, resident)
            pl.BlockSpec((d, d), lambda i: (0, 0)),               # dense weight (bf16, resident)
            pl.BlockSpec((1, d), lambda i: (0, 0)),               # bias (f32, resident)
        ],
        out_specs=pl.BlockSpec((tb, d), lambda i: (i, 0)),
        compiler_params=pltpu.CompilerParams(
            dimension_semantics=("parallel",),
            vmem_limit_bytes=int(budget)),
        cost_estimate=cost,
    )(ids, mask, emb, w, b)


# ----------------------------------------------------------------------------
# Kernel 2: AdMSoftmaxLoss (unique-sentence_id branch)
#   x1, x2: (N, D) read as the two halves of the pooled (2N, D) slab
#   x12 = row_l2_normalize(x1 @ x2^T); x21 = row_l2_normalize(x2 @ x1^T) = col_norm(g)
#   L_i = s*(x**[i,i] - m) - logsumexp_j(z[i,j]),  z[i,i]=s*(x**[i,i]-m), z[i,j]=s*x**[i,j]
#   loss = -mean(L12) - mean(L21)
# ----------------------------------------------------------------------------
def _adm_softmax_kernel(x1_ref, x2_ref, loss_ref, l12_ref, l21_ref, *, s, m):
    x1 = x1_ref[...]
    x2 = x2_ref[...]
    n = x1.shape[0]

    # Single Gram matrix (bf16 MXU inputs, f32 accumulation); x2 @ x1^T == g^T, so L21
    # comes from column-wise reductions of g (no 2nd matmul, no transpose).
    g = jax.lax.dot_general(
        x1.astype(jnp.bfloat16), x2.astype(jnp.bfloat16),
        dimension_numbers=(((1,), (1,)), ((), ())),
        preferred_element_type=jnp.float32)                       # (N, N) == x1 @ x2^T

    row = jax.lax.broadcasted_iota(jnp.int32, (n, n), 0)
    col = jax.lax.broadcasted_iota(jnp.int32, (n, n), 1)
    diag = row == col
    g2 = g * g                                                    # shared by both norms

    # ---- L12: row-normalize g, lane reductions -> (N, 1) ----
    inv12 = jax.lax.rsqrt(jnp.maximum(jnp.sum(g2, axis=1, keepdims=True), 1e-24))
    x12 = g * inv12
    z12 = s * jnp.where(diag, x12 - m, x12)
    num12 = jnp.sum(jnp.where(diag, z12, 0.0), axis=1, keepdims=True)
    mx12 = jnp.max(z12, axis=1, keepdims=True)                    # stabilized logsumexp
    lse12 = mx12 + jnp.log(jnp.sum(jnp.exp(z12 - mx12), axis=1, keepdims=True))
    l12 = num12 - lse12                                           # (N, 1)

    # ---- L21: rows of g^T are columns of g; sublane reductions -> (1, N), lane-dense ----
    inv21 = jax.lax.rsqrt(jnp.maximum(jnp.sum(g2, axis=0, keepdims=True), 1e-24))
    x21t = g * inv21                                              # x21t[j, i] == x21[i, j]
    z21 = s * jnp.where(diag, x21t - m, x21t)
    num21 = jnp.sum(jnp.where(diag, z21, 0.0), axis=0, keepdims=True)
    mx21 = jnp.max(z21, axis=0, keepdims=True)
    lse21 = mx21 + jnp.log(jnp.sum(jnp.exp(z21 - mx21), axis=0, keepdims=True))
    l21 = num21 - lse21                                           # (1, N)

    l12_ref[...] = l12   # (N,1) is fine at demo N; pack lane-dense if N grows large
    l21_ref[...] = l21
    loss_ref[0, 0] = -(jnp.sum(l12) + jnp.sum(l21)) / n           # == -mean(L12) - mean(L21)


def adm_softmax_loss(pooled, n, s=1.0, m=0.4):
    d = pooled.shape[1]
    kernel = functools.partial(_adm_softmax_kernel, s=float(s), m=float(m))
    loss, l12, l21 = pl.pallas_call(
        kernel,
        out_shape=(
            jax.ShapeDtypeStruct((1, 1), jnp.float32),            # scalar loss (SMEM)
            jax.ShapeDtypeStruct((n, 1), jnp.float32),            # L12 per-row
            jax.ShapeDtypeStruct((1, n), jnp.float32),            # L21 per-row (lane-dense)
        ),
        grid=(1,),
        in_specs=[
            pl.BlockSpec((n, d), lambda i: (0, 0)),               # x1 = pooled[:n]
            pl.BlockSpec((n, d), lambda i: (1, 0)),               # x2 = pooled[n:]
        ],
        out_specs=(
            pl.BlockSpec(memory_space=pltpu.MemorySpace.SMEM),
            pl.BlockSpec((n, 1), lambda i: (0, 0)),
            pl.BlockSpec((1, n), lambda i: (0, 0)),
        ),
    )(pooled, pooled)
    return loss[0, 0], l12[:, 0], l21[0, :]


# ----------------------------------------------------------------------------
# Critic.forward (== StructTransformer.forward with sentence_type='pool_mean')
# ----------------------------------------------------------------------------
def critic_forward(params, input1, input2, mask1, mask2, action1, action2,
                   sentence_id, s=1.0, m=0.4, row_tile=None):
    del action1, action2, sentence_id  # see TODO(synk) notes above
    emb, w, b = params["emb"], params["w"], params["b"]
    bsz = input1.shape[0]

    # Batch both sentence branches into one fused embed+dense+tanh+pool call.
    tokens = jnp.concatenate([input1, input2], axis=0).astype(jnp.int32)    # (2B, L)
    masks = jnp.concatenate([mask1, mask2], axis=0).astype(jnp.float32)     # (2B, L)

    pooled = encode_and_pool(tokens, masks, emb, w, b, row_tile=row_tile)   # (2B, D)
    loss, l12, l21 = adm_softmax_loss(pooled, bsz, s=s, m=m)                # halves via BlockSpecs
    x1, x2 = pooled[:bsz], pooled[bsz:]
    return (loss, l12, l21), (x1, x2)


def init_params(key, vocab_size, hidden):
    k0, k1, k2 = jax.random.split(key, 3)
    return {
        # Table and weight stored bf16 (MXU operands; halves resident DMA bytes).
        "emb": (jax.random.normal(k0, (vocab_size, hidden), jnp.float32) * 0.02
                ).astype(jnp.bfloat16),
        "w": (jax.random.normal(k1, (hidden, hidden), jnp.float32) * 0.02
              ).astype(jnp.bfloat16),
        "b": jax.random.normal(k2, (1, hidden), jnp.float32) * 0.02,
    }


if __name__ == "__main__":
    # D=128 keeps the hot tensors lane-aligned; 2B=16 rows -> 2 grid steps at tb=8.
    B, L, D, VOCAB = 8, 8, 128, 64
    key = jax.random.PRNGKey(0)
    kp, k1, k2, ka1, ka2, km1, km2 = jax.random.split(key, 7)

    params = init_params(kp, VOCAB, D)

    input1 = jax.random.randint(k1, (B, L), 0, VOCAB, dtype=jnp.int32)
    input2 = jax.random.randint(k2, (B, L), 0, VOCAB, dtype=jnp.int32)
    len1 = jax.random.randint(km1, (B, 1), 1, L + 1)
    len2 = jax.random.randint(km2, (B, 1), 1, L + 1)
    mask1 = (jnp.arange(L)[None, :] < len1).astype(jnp.float32)
    mask2 = (jnp.arange(L)[None, :] < len2).astype(jnp.float32)
    action1 = jax.random.uniform(ka1, (B, L, L), jnp.float32)   # struct_action_probs (unused)
    action2 = jax.random.uniform(ka2, (B, L, L), jnp.float32)
    sentence_id = jnp.arange(B, dtype=jnp.int32)                # unique ids -> diagonal branch

    (loss, l12, l21), (x1, x2) = critic_forward(
        params, input1, input2, mask1, mask2, action1, action2,
        sentence_id, s=1.0, m=0.4)

    jax.block_until_ready((loss, l12, l21, x1, x2))
    print("KERNEL_OK")
</pallas_src>

<mosaic_0001>
module attributes {stable_mosaic.version = 11 : i64} {
  func.func @_encode_pool_kernel(%arg0: i32, %arg1: memref<64x1xi32, #tpu.memory_space<vmem>>, %arg2: memref<8x8xf32, #tpu.memory_space<vmem>>, %arg3: memref<64x128xbf16, #tpu.memory_space<vmem>>, %arg4: memref<128x128xbf16, #tpu.memory_space<vmem>>, %arg5: memref<1x128xf32, #tpu.memory_space<vmem>>, %arg6: memref<8x128xf32, #tpu.memory_space<vmem>>) attributes {dimension_semantics = [#tpu.dimension_semantics<parallel>], iteration_bounds = array<i64: 2>, scalar_prefetch = 0 : i64, scratch_operands = 0 : i64, tpu.core_type = #tpu.core_type<tc>, window_params = [{transform_indices = @transform_0, window_bounds = array<i64: 64, 1>}, {transform_indices = @transform_1, window_bounds = array<i64: 8, 8>}, {pipeline_mode = #tpu.pipeline_mode<synchronous>, transform_indices = @transform_2, window_bounds = array<i64: 64, 128>}, {pipeline_mode = #tpu.pipeline_mode<synchronous>, transform_indices = @transform_3, window_bounds = array<i64: 128, 128>}, {pipeline_mode = #tpu.pipeline_mode<synchronous>, transform_indices = @transform_4, window_bounds = array<i64: 1, 128>}, {transform_indices = @transform_5, window_bounds = array<i64: 8, 128>}]} {
    %c0 = arith.constant 0 : index
    %c0_0 = arith.constant 0 : index
    %0 = vector.load %arg1[%c0, %c0_0] : memref<64x1xi32, #tpu.memory_space<vmem>>, vector<64x1xi32>
    %c0_1 = arith.constant 0 : index
    %c0_2 = arith.constant 0 : index
    %1 = vector.load %arg2[%c0_1, %c0_2] : memref<8x8xf32, #tpu.memory_space<vmem>>, vector<8x8xf32>
    %c0_3 = arith.constant 0 : index
    %c0_4 = arith.constant 0 : index
    %2 = vector.load %arg3[%c0_3, %c0_4] : memref<64x128xbf16, #tpu.memory_space<vmem>>, vector<64x128xbf16>
    %c0_5 = arith.constant 0 : index
    %c0_6 = arith.constant 0 : index
    %3 = vector.load %arg4[%c0_5, %c0_6] : memref<128x128xbf16, #tpu.memory_space<vmem>>, vector<128x128xbf16>
    %c0_7 = arith.constant 0 : index
    %c0_8 = arith.constant 0 : index
    %4 = vector.load %arg5[%c0_7, %c0_8] : memref<1x128xf32, #tpu.memory_space<vmem>>, vector<1x128xf32>
    %5 = tpu.iota {dimensions = array<i32: 1>} : vector<64x64xi32>
    %6 = vector.broadcast %0 : vector<64x1xi32> to vector<64x64xi32>
    %7 = arith.cmpi eq, %6, %5 : vector<64x64xi32>
    %8 = arith.extui %7 : vector<64x64xi1> to vector<64x64xi32>
    %9 = arith.sitofp %8 : vector<64x64xi32> to vector<64x64xf32>
    %10 = arith.truncf %9 : vector<64x64xf32> to vector<64x64xbf16>
    %cst = arith.constant dense<0.000000e+00> : vector<64x128xf32>
    %11 = tpu.matmul %10, %2, %cst {dimension_numbers = #tpu.dot_dimension_numbers<[1], [0], [0], [1], [0, 0, 1, 1], [], []>} : vector<64x64xbf16>, vector<64x128xbf16>, vector<64x128xf32> -> vector<64x128xf32>
    %12 = arith.truncf %11 : vector<64x128xf32> to vector<64x128xbf16>
    %cst_9 = arith.constant dense<0.000000e+00> : vector<64x128xf32>
    %13 = tpu.matmul %12, %3, %cst_9 {dimension_numbers = #tpu.dot_dimension_numbers<[1], [0], [0], [1], [0, 0, 1, 1], [], []>} : vector<64x128xbf16>, vector<128x128xbf16>, vector<64x128xf32> -> vector<64x128xf32>
    %14 = vector.broadcast %4 : vector<1x128xf32> to vector<64x128xf32>
    %15 = arith.addf %13, %14 : vector<64x128xf32>
    %16 = math.tanh %15 : vector<64x128xf32>
    %17 = vector.shape_cast %16 : vector<64x128xf32> to vector<8x8x128xf32>
    %18 = vector.shape_cast %1 : vector<8x8xf32> to vector<8x8x1xf32>
    %19 = vector.broadcast %18 : vector<8x8x1xf32> to vector<8x8x128xf32>
    %20 = arith.mulf %17, %19 : vector<8x8x128xf32>
    %cst_10 = arith.constant dense<0.000000e+00> : vector<8x128xf32>
    %21 = vector.multi_reduction <add>, %20, %cst_10 [1] : vector<8x8x128xf32> to vector<8x128xf32>
    %cst_11 = arith.constant dense<0.000000e+00> : vector<8xf32>
    %22 = vector.multi_reduction <add>, %1, %cst_11 [1] : vector<8x8xf32> to vector<8xf32>
    %23 = vector.shape_cast %22 : vector<8xf32> to vector<8x1xf32>
    %cst_12 = arith.constant 1.000000e+00 : f32
    %24 = vector.broadcast %cst_12 : f32 to vector<8x1xf32>
    %25 = arith.maximumf %23, %24 : vector<8x1xf32>
    %26 = vector.broadcast %25 : vector<8x1xf32> to vector<8x128xf32>
    %27 = arith.divf %21, %26 : vector<8x128xf32>
    %c0_13 = arith.constant 0 : index
    %c0_14 = arith.constant 0 : index
    %28 = vector.load %arg6[%c0_13, %c0_14] : memref<8x128xf32, #tpu.memory_space<vmem>>, vector<8x128xf32>
    tpu.vector_store %arg6[%c0_13, %c0_14], %27 {strides = array<i32>} : memref<8x128xf32, #tpu.memory_space<vmem>>, vector<8x128xf32>,
    return
  }
  func.func @transform_0(%arg0: i32) -> (i32, i32) {
    %c0_i32 = arith.constant 0 : i32
    %c0_i32_0 = arith.constant 0 : i32
    return %arg0, %c0_i32 : i32, i32
  }
  func.func @transform_1(%arg0: i32) -> (i32, i32) {
    %c0_i32 = arith.constant 0 : i32
    %c0_i32_0 = arith.constant 0 : i32
    return %arg0, %c0_i32 : i32, i32
  }
  func.func @transform_2(%arg0: i32) -> (i32, i32) {
    %c0_i32 = arith.constant 0 : i32
    %c0_i32_0 = arith.constant 0 : i32
    %c0_i32_1 = arith.constant 0 : i32
    return %c0_i32, %c0_i32_0 : i32, i32
  }
  func.func @transform_3(%arg0: i32) -> (i32, i32) {
    %c0_i32 = arith.constant 0 : i32
    %c0_i32_0 = arith.constant 0 : i32
    %c0_i32_1 = arith.constant 0 : i32
    return %c0_i32, %c0_i32_0 : i32, i32
  }
  func.func @transform_4(%arg0: i32) -> (i32, i32) {
    %c0_i32 = arith.constant 0 : i32
    %c0_i32_0 = arith.constant 0 : i32
    %c0_i32_1 = arith.constant 0 : i32
    return %c0_i32, %c0_i32_0 : i32, i32
  }
  func.func @transform_5(%arg0: i32) -> (i32, i32) {
    %c0_i32 = arith.constant 0 : i32
    %c0_i32_0 = arith.constant 0 : i32
    return %arg0, %c0_i32 : i32, i32
  }
}

</mosaic_0001>

<bundles_post_ra>
// kernel: tpu_custom_call.1
= control target key start
LH: loop header
LB: loop body
LE: loop exit
PB: predicated region body
PF: predicated region fallthrough
CT: control target
= control target key end

     0   :  { %10 = vsyncpa [#allocation3], 0  ;;  %s1256_s0 = inlined_call_operand.vmem [shape: s32[128,1], index: 0, kind: input, shape index: {}]   ;;  %s1257_s1 = inlined_call_operand.vmem [shape: f32[16,8], index: 1, kind: input, shape index: {}]   ;;  %s1258_s2 = inlined_call_operand.vmem [shape: bf16[64,128], index: 2, kind: input, shape index: {}]   ;;  %s1259_s3 = inlined_call_operand.vmem [shape: bf16[128,128], index: 3, kind: input, shape index: {}]   ;;  %s1260_s4 = inlined_call_operand.vmem [shape: f32[1,128], index: 4, kind: input, shape index: {}]   ;;  %s1261_s5 = inlined_call_operand.hbm [shape: f32[16,128], index: 5, kind: output, shape index: {}]  }
   0x1   :  { %12 = vsyncpa [#allocation3 + $0x1], 0  ;;  %s1108_s18 = smov 0   ;;  %s1110_s19 = smov 0  }
   0x2   :  { %s1112_s20 = smov 0   ;;  %s1114_s21 = smov 0  }
   0x3 LB: > { %s1129_s22 = sadd.s32 4294967295, %s1073_s21   ;;  %s829_s23 = sadd.s32 4294967294, %s1073_s21   ;;  %s1073_s21 = sphi %s1114_s21, %s1267_s21   ;;  %s1069_s20 = sphi %s1112_s20, %s1266_s20   ;;  %s1065_s19 = sphi %s1110_s19, %s1265_s19   ;;  %s1061_s18 = sphi %s1108_s18, %s1264_s18  }
   0x4   : > { %s1133_s24 = sadd.s32 1, %s1073_s21   ;;  %s140_s25 = sadd.s32 1, %s1069_s20 }
   0x5   : > { %s137_s26 = ssub.s32 %s1073_s21, %s1133_s24  ;;  %p150_p0 = scmp.ne.s32.totalorder %s1069_s20, %s1065_s19 }
   0x6   : > { %p138_p1 = scmp.eq.s32.totalorder %s137_s26, 0  ;;  %p151_p2 = scmp.eq.s32.totalorder %s1129_s22, 1 }
   0x7   : > { %p156_p3 = scmp.ne.s32.totalorder %s1065_s19, %s1061_s18  ;;  %p157_p4 = scmp.eq.s32.totalorder %s829_s23, 1 }
   0x8   : > { %s1144_s27 = scalar_select %p138_p1, %s1069_s20, %s140_s25  }
   0x9   : > { %p1146_p5 = por %p151_p2, %p150_p0  ;;  %p1150_p6 = por %p157_p4, %p156_p3 }
   0xa   : > { %p832_p7 = scmp.ge.s32.totalorder %s1073_s21, 1  ;;  %p200_p8 = scmp.lt.s32.totalorder %s1073_s21, 3 }
   0xc   : > { %p201_p9 = pnand %p832_p7, %p200_p8 }
   0xd   : > { %s834_s30 = sshll.u32 (!%p201_p9), %s1129_s22, 3  ;;  %p238_p11 = scmp.lt.s32.totalorder (!%p201_p9), %s1129_s22, 1 }
   0xe   : > { %204 = sbr.rel (%p201_p9) target bundleno = 616 (0x268), region = 40  ;;  %p233_p10 = scmp.lt.s32.totalorder (!%p201_p9), %s834_s30, 15 }
   0xf   : > { %s229_s9 = sand.u32 (!%p201_p9), 1, %s1065_s19   ;;  %s863_s11 = sshll.u32 (!%p201_p9), %s1129_s22, 7 }
  0x10   : > { %s1219_s16 = scalar_lea.hbm (!%p201_p9), %s1261_s5, %s863_s11  ;;  %s745_s17 = scalar_lea.sflag (!%p201_p9), [#allocation3], %s229_s9 }
  0x13   : > { %v1075_v0 = vmov 0   ;;  %v969_v1 = vld [vmem:[%s1258_s2 + $0x18] sm:$0xff]   ;;  %v970_v2 = vld [vmem:[%s1258_s2 + $0x10] sm:$0xff]   ;;  %s1269_s30 = smov (!%p233_p10, %s834_s30), 15  ;;  %v971_v3 = vld [vmem:[%s1258_s2 + $0x8] sm:$0xff]   ;;  %v277_v19 = vlaneseq  ;;  %vm355_vm4 = vcmask 523264  }
  0x14   : > { %968 = vset.pattern.permute.xlu1 %v1075_v0  ;;  %967 = vset.pattern.permute.xlu0 %v1075_v0  ;;  %s835_s10 = sshll.u32 %s1269_s30, 3  ;;  %v972_v8 = vld [vmem:[%s1258_s2] sm:$0xff]   ;;  %v973_v13 = vld [vmem:[%s1259_s3 + $0x38] sm:$0xff]   ;;  %v974_v14 = vld [vmem:[%s1259_s3 + $0x30] sm:$0xff]   ;;  %v1076_v25 = vmov 0.0   ;;  %vm676_vm9 = vcmask 64512  }
  0x15   : > { %886 = vmatprep.subr.bf16.mxu0 %v969_v1  ;;  %s236_s15 = scalar_lea.vmem %s1256_s0, %s835_s10  ;;  %902 = vmatprep.subr.bf16.mxu1 %v973_v13  ;;  %v975_v15 = vld [vmem:[%s1259_s3 + $0x28] sm:$0xff]   ;;  %v976_v16 = vld [vmem:[%s1259_s3 + $0x20] sm:$0xff]   ;;  %v977_v17 = vld [vmem:[%s1259_s3 + $0x18] sm:$0xff]   ;;  %v278_v20 = vand.u32 127, %v277_v19  ;;  %v565_v44 = vshrl.u32 %v277_v19, 7  ;;  %vm722_vm10 = vcmask 1041409  }
  0x16   : > { %887 = vmatpush3.bf16.msra.mxu0 %v969_v1  ;;  %v245_v4 = vld [vmem:[%s236_s15 + $0x10] sm:$0xff]  ;;  %v243_v5 = vld [vmem:[%s236_s15] sm:$0xff]  ;;  %v246_v6 = vld [vmem:[%s236_s15 + $0x18] sm:$0xff]  ;;  %903 = vmatpush3.bf16.msra.mxu1 %v973_v13  ;;  %s239_s23 = scalar_select %p238_p11, %s1129_s22, 1  ;;  %vm725_vm11 = vcmask 1042434   ;;  %vm728_vm12 = vcmask 1043459  }
  0x17   : > { %888 = vmatprep.subr.bf16.mxu0 %v970_v2  ;;  %286 = vperm.xlu1 %968, %v245_v4   ;;  %v244_v7 = vld [vmem:[%s236_s15 + $0x8] sm:$0xff]  ;;  %v247_v10 = vld [vmem:[%s236_s15 + $0x20] sm:$0xff]  ;;  %v250_v11 = vld [vmem:[%s236_s15 + $0x38] sm:$0xff]  ;;  %v573_v45 = vsub.s32 1, %v565_v44  ;;  %v580_v46 = vsub.s32 2, %v565_v44  ;;  %v566_v51 = vsub.s32 0, %v565_v44 }
  0x18   : > { %280 = vperm.xlu0 %967, %v243_v5   ;;  %v248_v9 = vld [vmem:[%s236_s15 + $0x28] sm:$0xff]  ;;  %v249_v12 = vld [vmem:[%s236_s15 + $0x30] sm:$0xff]  ;;  %904 = vmatprep.subr.bf16.mxu1 %v974_v14  ;;  %v980_v43 = vld [vmem:[%s1259_s3] sm:$0xff]   ;;  %s836_s25 = sshll.u32 %s239_s23, 3  ;;  %v587_v53 = vsub.s32 3, %v565_v44  ;;  %v594_v55 = vsub.s32 4, %v565_v44 }
  0x19   : > { %v978_v18 = vld [vmem:[%s1259_s3 + $0x10] sm:$0xff]   ;;  %v979_v42 = vld [vmem:[%s1259_s3 + $0x8] sm:$0xff]   ;;  %s241_s6 = scalar_lea.vmem %s1257_s1, %s836_s25  ;;  %v601_v57 = vsub.s32 5, %v565_v44  ;;  %v608_v59 = vsub.s32 6, %v565_v44  ;;  %v615_v61 = vsub.s32 7, %v565_v44  ;;  %s1211_s10 = sshll.u32 %s229_s9, 3 }
  0x1a   : > { %889 = vmatpush3.bf16.msra.mxu0 %v970_v2  ;;  %905 = vmatpush3.bf16.msra.mxu1 %v974_v14  ;;  %v251_v47 = vld [vmem:[%s241_s6] sm:$0xff]  ;;  %vm731_vm13 = vcmask 1044484   ;;  %vm734_vm14 = vcmask 1045509   ;;  %vm737_vm15 = vcmask 1046534   ;;  %s231_s12 = scalar_lea.vmem [#allocation2], %s1211_s10  ;;  %s1077_s23 = smov [#allocation2]  }
  0x1b   : > { %890 = vmatprep.subr.bf16.mxu0 %v971_v3  ;;  %289 = vperm.xlu1 %968, %v246_v6   ;;  %v677_v48 = vsel %vm676_vm9, %v251_v47, 0.0  ;;  %v574_v49 = vrot.slane %v251_v47, %v573_v45  ;;  %v581_v50 = vrot.slane %v251_v47, %v580_v46  ;;  %v567_v52 = vrot.slane %v251_v47, %v566_v51  ;;  %v853_v14 = vld [vmem:[%s1260_s4] ss:$0 sm:$0xff]  ;;  %s758_s13 = sshll.u32 %s231_s12, 4  ;;  %s1017_s25 = sshll.u32 %s1077_s23, 4  ;;  %s759_s13 = int_to_ptr.vmem [resolvable:$true] %s758_s13  ;;  %s1018_s25 = int_to_ptr.vmem [resolvable:$false] %s1017_s25 }
  0x1c   : > { %283 = vperm.xlu0 %967, %v244_v7   ;;  %906 = vmatprep.subr.bf16.mxu1 %v975_v15  ;;  %v588_v54 = vrot.slane %v251_v47, %v587_v53  ;;  %v595_v56 = vrot.slane %v251_v47, %v594_v55  ;;  %v602_v58 = vrot.slane %v251_v47, %v601_v57  ;;  %s1013_s22 = scalar_lea.vmem %s759_s13, 128  ;;  %s1019_s26 = scalar_lea.vmem %s1018_s25, 256 }
  0x1d   : > { %v609_v60 = vrot.slane %v251_v47, %v608_v59  ;;  %v616_v62 = vrot.slane %v251_v47, %v615_v61  ;;  %p1014_p12 = scmp.ne.s32.totalorder %s759_s13, %s1013_s22  ;;  %p1020_p1 = scmp.lt.s32.totalorder %s759_s13, %s1018_s25 }
  0x1e   : > { %891 = vmatpush3.bf16.msra.mxu0 %v971_v3  ;;  %907 = vmatpush3.bf16.msra.mxu1 %v975_v15  ;;  %p1021_p2 = scmp.lt.s32.totalorder %s1019_s26, %s1013_s22 }
  0x1f   : > { %892 = vmatprep.subr.bf16.mxu0 %v972_v8  ;;  %295 = vperm.xlu1 %968, %v248_v9   ;;  %p1015_p13 = pnand %p1014_p12, %p1146_p5 }
  0x20   : > { %292 = vperm.xlu0 %967, %v247_v10   ;;  %908 = vmatprep.subr.bf16.mxu1 %v976_v16  ;;  %p1022_p3 = por %p1021_p2, %p1020_p1 }
  0x21   : > { %p1016_p0 = pneg %p1015_p13 }
  0x22   : > { %893 = vmatpush3.bf16.msra.mxu0 %v972_v8  ;;  %909 = vmatpush3.bf16.msra.mxu1 %v976_v16 }
  0x23   : > { %301 = vperm.xlu1 %968, %v250_v11   ;;  %910 = vmatprep.subr.bf16.mxu1 %v977_v17  ;;  %p1023_p4 = pnand %p1022_p3, %p1016_p0 }
  0x24   : > { %298 = vperm.xlu0 %967, %v249_v12  }
  0x26   : > { %911 = vmatpush3.bf16.msra.mxu1 %v977_v17 }
  0x27   : > { %912 = vmatprep.subr.bf16.mxu1 %v978_v18  ;;  %576 = vbcast.lane.b32.xlu1 %v574_v49, 256 }
  0x2a   : > { %913 = vmatpush3.bf16.msra.mxu1 %v978_v18 }
  0x2b   : > { %914 = vmatprep.subr.bf16.mxu1 %v979_v42  ;;  %583 = vbcast.lane.b32.xlu1 %v581_v50, 256 }
  0x2e   : > { %915 = vmatpush3.bf16.msra.mxu1 %v979_v42 }
  0x2f   : > { %916 = vmatprep.subr.bf16.mxu1 %v980_v43  ;;  %569 = vbcast.lane.b32.xlu1 %v567_v52, 256 }
  0x32   : > { %917 = vmatpush3.bf16.msra.mxu1 %v980_v43 }
  0x33   : > { %590 = vbcast.lane.b32.xlu1 %v588_v54, 256 }
  0x37   : > { %597 = vbcast.lane.b32.xlu1 %v595_v56, 256 }
  0x3b   : > { %604 = vbcast.lane.b32.xlu1 %v602_v58, 256 }
  0x3f   : > { %611 = vbcast.lane.b32.xlu1 %v609_v60, 256 }
  0x43   : > { %678 = vadd.xlane.f32.xlu0 %v677_v48  ;;  %618 = vbcast.lane.b32.xlu1 %v616_v62, 256 }
  0x92   : > { %v287_v21 = vpop.permute.xlu1 %286 }
  0x93   : > { %v281_v22 = vpop.permute.xlu0 %280  ;;  %vm305_vm0 = vcmp.eq.s32.totalorder %v287_v21, %v278_v20 }
  0x94   : > { %vm303_vm1 = vcmp.eq.s32.totalorder %v281_v22, %v278_v20  ;;  %v839_v26 = vsel %vm305_vm0, 1.0, %v1076_v25  ;;  %vm740_vm0 = vcmask 1047559  }
  0x95   : > { %v837_v27 = vsel %vm303_vm1, 1.0, %v1076_v25 }
  0x96   : > { %v290_v23 = vpop.permute.xlu1 %289 }
  0x97   : > { %v284_v24 = vpop.permute.xlu0 %283  ;;  %vm306_vm2 = vcmp.eq.s32.totalorder %v290_v23, %v278_v20 }
  0x98   : > { %vm304_vm3 = vcmp.eq.s32.totalorder %v284_v24, %v278_v20  ;;  %v840_v28 = vsel %vm306_vm2, 1.0, %v1076_v25 }
  0x99   : > { %v838_v29 = vsel %vm304_vm3, 1.0, %v1076_v25  ;;  %v328_v30 = vpack.c.bf16 %v840_v28, %v839_v26 }
  0x9a   : > { %v327_v31 = vpack.c.bf16 %v838_v29, %v837_v27  ;;  %v296_v32 = vpop.permute.xlu1 %295 }
  0x9b   : > { %v293_v33 = vpop.permute.xlu0 %292  ;;  %vm308_vm5 = vcmp.eq.s32.totalorder %v296_v32, %v278_v20 }
  0x9c   : > { %vm307_vm6 = vcmp.eq.s32.totalorder %v293_v33, %v278_v20  ;;  %894 = vmatprep.mubr.msk.bf16.mxu0 %vm355_vm4, %v327_v31  ;;  %v842_v34 = vsel %vm308_vm5, 1.0, %v1076_v25 }
  0x9d   : > { %v841_v35 = vsel %vm307_vm6, 1.0, %v1076_v25  ;;  %895 = vmatmul.mubr.msk.bf16.vlgmr.msra.gmra.mxu0 %vm355_vm4, %v328_v30 }
  0x9e   : > { %v329_v36 = vpack.c.bf16 %v842_v34, %v841_v35  ;;  %v302_v37 = vpop.permute.xlu1 %301 }
  0x9f   : > { %v299_v38 = vpop.permute.xlu0 %298  ;;  %vm310_vm7 = vcmp.eq.s32.totalorder %v302_v37, %v278_v20 }
  0xa0   : > { %vm309_vm8 = vcmp.eq.s32.totalorder %v299_v38, %v278_v20  ;;  %898 = vmatprep.mubr.msk.bf16.mxu0 %vm355_vm4, %v329_v36  ;;  %v844_v39 = vsel %vm310_vm7, 1.0, %v1076_v25 }
  0xa1   : > { %v843_v40 = vsel %vm309_vm8, 1.0, %v1076_v25 }
  0xa2   : > { %v330_v41 = vpack.c.bf16 %v844_v39, %v843_v40  ;;  %v577_v11 = vpop.permute.xlu1 %576 }
  0xa5   : > { %899 = vmatmul.mubr.msk.bf16.gmra.mxu0 %vm355_vm4, %v330_v41 }
  0xa6   : > { %v584_v12 = vpop.permute.xlu1 %583 }
  0xaa   : > { %v570_v13 = vpop.permute.xlu1 %569 }
  0xae   : > { %v591_v19 = vpop.permute.xlu1 %590 }
  0xb2   : > { %v598_v27 = vpop.permute.xlu1 %597 }
  0xb6   : > { %v605_v36 = vpop.permute.xlu1 %604 }
  0xba   : > { %v612_v48 = vpop.permute.xlu1 %611 }
  0xcc   : > { %v679_v25 = vpop.xlane.xlu0 %678 }
  0xcd   : > { %v680_v30 = vmax.f32 %v679_v25, 1.0 }
  0xcf   : > { %v683_v34 = vrot.slane %v680_v30, 2  ;;  %v682_v39 = vrot.slane %v680_v30, 1  ;;  %v684_v41 = vrot.slane %v680_v30, 3  ;;  %v685_v50 = vrot.slane %v680_v30, 4 }
  0xd0   : > { %v686_v56 = vrot.slane %v680_v30, 5  ;;  %v687_v57 = vrot.slane %v680_v30, 6 }
 0x15d   : > { %v896_v63 = vpop.f32.mrf.mxu0 }
 0x15f   : > { %v402_v0 = vpop.f32.mrf.mxu0 }
 0x161   : > { %v897_v1 = vpop.f32.mrf.mxu0 }
 0x162   : > { %v434_v4 = vpack.c.bf16 %v897_v1, %v896_v63 }
 0x163   : > { %v405_v2 = vpop.f32.mrf.mxu0 }
 0x164   : > { %v433_v3 = vpack.c.bf16 %v405_v2, %v402_v0  ;;  %v688_v0 = vrot.slane %v680_v30, 7 }
 0x165   : > { %v900_v5 = vpop.f32.mrf.mxu0 }
 0x166   : > { %918 = vmatprep.mubr.bf16.mxu1 %v433_v3 }
 0x167   : > { %v418_v6 = vpop.f32.mrf.mxu0  ;;  %919 = vmatmul.mubr.bf16.vlgmr.msra.gmra.mxu1 %v434_v4  ;;  %v619_v4 = vpop.permute.xlu1 %618 }
 0x169   : > { %v901_v7 = vpop.f32.mrf.mxu0 }
 0x16a   : > { %v436_v10 = vpack.c.bf16 %v901_v7, %v900_v5 }
 0x16b   : > { %v421_v8 = vpop.f32.mrf.mxu0 }
 0x16c   : > { %v435_v9 = vpack.c.bf16 %v421_v8, %v418_v6 }
 0x16e   : > { %922 = vmatprep.mubr.bf16.mxu1 %v435_v9 }
 0x16f   : > { %923 = vmatmul.mubr.bf16.gmra.mxu1 %v436_v10 }
 0x227   : > { %v920_v15 = vpop.f32.mrf.mxu1 }
 0x228   : > { %v534_v16 = vadd.f32 %v920_v15, %v853_v14 }
 0x229   : > { %v525_v17 = vpop.f32.mrf.mxu1 }
 0x22a   : > { %981 = vtanh.f32 %v534_v16  ;;  %v526_v18 = vadd.f32 %v853_v14, %v525_v17 }
 0x22b   : > { %v921_v20 = vpop.f32.mrf.mxu1 }
 0x22c   : > { %983 = vtanh.f32 %v526_v18  ;;  %v537_v21 = vadd.f32 %v921_v20, %v853_v14 }
 0x22d   : > { %v528_v22 = vpop.f32.mrf.mxu1 }
 0x22e   : > { %985 = vtanh.f32 %v537_v21  ;;  %v529_v23 = vadd.f32 %v853_v14, %v528_v22 }
 0x22f   : > { %v924_v24 = vpop.f32.mrf.mxu1 }
 0x230   : > { %987 = vtanh.f32 %v529_v23  ;;  %v550_v26 = vadd.f32 %v924_v24, %v853_v14 }
 0x231   : > { %v541_v28 = vpop.f32.mrf.mxu1 }
 0x232   : > { %989 = vtanh.f32 %v550_v26  ;;  %v542_v29 = vadd.f32 %v853_v14, %v541_v28 }
 0x233   : > { %v925_v31 = vpop.f32.mrf.mxu1 }
 0x234   : > { %991 = vtanh.f32 %v542_v29  ;;  %v553_v32 = vadd.f32 %v925_v31, %v853_v14 }
 0x235   : > { %v544_v33 = vpop.f32.mrf.mxu1 }
 0x236   : > { %993 = vtanh.f32 %v553_v32  ;;  %v545_v35 = vadd.f32 %v853_v14, %v544_v33 }
 0x237   : > { %v982_v37 = vpop.eup %981 }
 0x238   : > { %v622_v38 = vmul.f32 %v982_v37, %v584_v12  ;;  %995 = vtanh.f32 %v545_v35 }
 0x239   : > { %v984_v40 = vpop.eup %983  ;;  %997 = vrcp.f32 %v683_v34 }
 0x23a   : > { %v640_v42 = vrot.slane %v622_v38, 4  ;;  %v620_v43 = vmul.f32 %v984_v40, %v570_v13  ;;  %999 = vrcp.f32 %v680_v30 }
 0x23b   : > { %v986_v44 = vpop.eup %985  ;;  %1001 = vrcp.f32 %v682_v39 }
 0x23c   : > { %v641_v45 = vadd.f32 %v640_v42, %v622_v38  ;;  %v628_v46 = vrot.slane %v620_v43, 4  ;;  %v623_v47 = vmul.f32 %v986_v44, %v591_v19  ;;  %1003 = vrcp.f32 %v684_v41 }
 0x23d   : > { %v988_v49 = vpop.eup %987  ;;  %1005 = vrcp.f32 %v685_v50 }
 0x23e   : > { %v642_v51 = vrot.slane %v641_v45, 2  ;;  %v621_v52 = vmul.f32 %v988_v49, %v577_v11  ;;  %v629_v53 = vadd.f32 %v628_v46, %v620_v43  ;;  %v646_v54 = vrot.slane %v623_v47, 4 }
 0x23f   : > { %v990_v55 = vpop.eup %989  ;;  %1007 = vrcp.f32 %v687_v57 }
 0x240   : > { %v643_v58 = vadd.f32 %v642_v51, %v641_v45  ;;  %v634_v59 = vrot.slane %v621_v52, 4  ;;  %v630_v60 = vrot.slane %v629_v53, 2  ;;  %v647_v61 = vadd.f32 %v646_v54, %v623_v47 }
 0x241   : > { %v992_v62 = vpop.eup %991  ;;  %v626_v63 = vmul.f32 %v990_v55, %v612_v48  ;;  %1009 = vrcp.f32 %v686_v56 }
 0x242   : > { %v635_v1 = vadd.f32 %v634_v59, %v621_v52  ;;  %v631_v2 = vadd.f32 %v630_v60, %v629_v53  ;;  %v648_v3 = vrot.slane %v647_v61, 2  ;;  %v644_v6 = vrot.slane %v643_v58, 1 }
 0x243   : > { %v994_v5 = vpop.eup %993  ;;  %v624_v7 = vmul.f32 %v992_v62, %v598_v27  ;;  %v664_v8 = vrot.slane %v626_v63, 4  ;;  %1011 = vrcp.f32 %v688_v0 }
 0x244   : > { %v636_v9 = vrot.slane %v635_v1, 2  ;;  %v649_v10 = vadd.f32 %v648_v3, %v647_v61  ;;  %v627_v14 = vmul.f32 %v994_v5, %v619_v4  ;;  %v632_v16 = vrot.slane %v631_v2, 1 }
 0x245   : > { %v996_v11 = vpop.eup %995  ;;  %v652_v12 = vrot.slane %v624_v7, 4  ;;  %v665_v13 = vadd.f32 %v664_v8, %v626_v63  ;;  %v645_v20 = vadd.f32 %v644_v6, %v643_v58 }
 0x246   : > { %v637_v15 = vadd.f32 %v636_v9, %v635_v1  ;;  %v650_v17 = vrot.slane %v649_v10, 1  ;;  %v625_v18 = vmul.f32 %v996_v11, %v605_v36  ;;  %v998_v19 = vpop.eup %997  ;;  %v670_v23 = vrot.slane %v627_v14, 4 }
 0x247   : > { %v653_v21 = vadd.f32 %v652_v12, %v624_v7  ;;  %v666_v22 = vrot.slane %v665_v13, 2  ;;  %v1000_v24 = vpop.eup %999  ;;  %v633_v33 = vadd.f32 %v632_v16, %v631_v2  ;;  %v702_v39 = vmul.f32 %v998_v19, %v645_v20 }
 0x248   : > { %v638_v25 = vrot.slane %v637_v15, 1  ;;  %v658_v26 = vrot.slane %v625_v18, 4  ;;  %v1002_v27 = vpop.eup %1001  ;;  %v671_v30 = vadd.f32 %v670_v23, %v627_v14  ;;  %v651_v34 = vadd.f32 %v650_v17, %v649_v10 }
 0x249   : > { %v654_v28 = vrot.slane %v653_v21, 2  ;;  %v667_v29 = vadd.f32 %v666_v22, %v665_v13  ;;  %v1004_v31 = vpop.eup %1003  ;;  %v698_v46 = vmul.f32 %v1000_v24, %v633_v33  ;;  %v724_v52 = vrot.slane %v702_v39, 6 }
 0x24a   : > { %v639_v32 = vadd.f32 %v638_v25, %v637_v15  ;;  %v659_v35 = vadd.f32 %v658_v26, %v625_v18  ;;  %v672_v38 = vrot.slane %v671_v30, 2  ;;  %v1006_v44 = vpop.eup %1005  ;;  %v704_v47 = vmul.f32 %v1004_v31, %v651_v34 }
 0x24b   : > { %v655_v37 = vadd.f32 %v654_v28, %v653_v21  ;;  %v668_v36 = vrot.slane %v667_v29, 1 }
 0x24c   : > { %v660_v40 = vrot.slane %v659_v35, 2  ;;  %v700_v41 = vmul.f32 %v1002_v27, %v639_v32  ;;  %v673_v43 = vadd.f32 %v672_v38, %v671_v30  ;;  %v1008_v53 = vpop.eup %1007  ;;  %v727_v62 = vrot.slane %v704_v47, 5 }
 0x24d   : > { %v656_v42 = vrot.slane %v655_v37, 1  ;;  %v669_v50 = vadd.f32 %v668_v36, %v667_v29 }
 0x24e   : > { %v661_v45 = vadd.f32 %v660_v40, %v659_v35  ;;  %v721_v48 = vrot.slane %v700_v41, 7  ;;  %v674_v51 = vrot.slane %v673_v43, 1  ;;  %v1010_v56 = vpop.eup %1009 }
 0x24f   : > { %v657_v49 = vadd.f32 %v656_v42, %v655_v37  ;;  %v710_v0 = vmul.f32 %v1008_v53, %v669_v50 }
 0x250   : > { %v662_v54 = vrot.slane %v661_v45, 1  ;;  %v723_v55 = vsel %vm722_vm10, %v721_v48, %v698_v46  ;;  %v675_v58 = vadd.f32 %v674_v51, %v673_v43  ;;  %v1012_v60 = vpop.eup %1011 }
 0x251   : > { %v706_v57 = vmul.f32 %v1006_v44, %v657_v49  ;;  %v726_v59 = vsel %vm725_vm11, %v724_v52, %v723_v55  ;;  %v736_v5 = vrot.slane %v710_v0, 2 }
 0x252   : > { %v663_v61 = vadd.f32 %v662_v54, %v661_v45  ;;  %v712_v2 = vmul.f32 %v1012_v60, %v675_v58  ;;  %v729_v3 = vsel %vm728_vm12, %v727_v62, %v726_v59 }
 0x253   : > { %v730_v63 = vrot.slane %v706_v57, 4 }
 0x254   : > { %v708_v1 = vmul.f32 %v1010_v56, %v663_v61  ;;  %v739_v8 = vrot.slane %v712_v2, 1 }
 0x255   : > { %v732_v6 = vsel %vm731_vm13, %v730_v63, %v729_v3 }
 0x256   : > { %v733_v4 = vrot.slane %v708_v1, 3 }
 0x258   : > { %v735_v7 = vsel %vm734_vm14, %v733_v4, %v732_v6 }
 0x259   : > { %v738_v9 = vsel %vm737_vm15, %v736_v5, %v735_v7 }
 0x25a   : > { %v741_v10 = vsel %vm740_vm0, %v739_v8, %v738_v9 }
 0x25b   : > { %743 = vst [vmem:[%s231_s12] sm:$0xff] %v741_v10 }
 0x25c   : > { %1026 = shalt.err (!%p1023_p4)
}
 0x25d   : > { %s1027_s30 = scalar_lea.hbm %s1219_s16, 128  ;;  %s1031_s8 = scalar_lea.hbm %s1261_s5, 256 }
 0x25e   : > { %p1028_p7 = scmp.ne.s32.totalorder %s1219_s16, %s1027_s30  ;;  %p1032_p10 = scmp.lt.s32.totalorder %s1219_s16, %s1261_s5 }
 0x25f   : > { %p1033_p11 = scmp.lt.s32.totalorder %s1031_s8, %s1027_s30 }
 0x260   : > { %p1029_p8 = pnand %p1028_p7, %p1146_p5 }
 0x261   : > { %p1034_p12 = por %p1033_p11, %p1032_p10 }
 0x262   : > { %p1030_p9 = pneg %p1029_p8 }
 0x264   : > { %p1035_p13 = pnand %p1034_p12, %p1030_p9 }
 0x266   : > { %1038 = shalt.err (!%p1035_p13)
}
 0x267   : > { %926 = dma.vmem_to_hbm [thread:$0]  (%p1146_p5), %s759_s13, 128, %s1219_s16, %s745_s17  }
 0x268 PF: > { %p932_p0 = scmp.ge.s32.totalorder %s1073_s21, 2  ;;  %s770_s11 = sand.u32 1, %s1061_s18  }
 0x269   : > { %s771_s12 = scalar_lea.sflag [#allocation3], %s770_s11 }
 0x26a   : > { %p929_p1 = pnand %p932_p0, %p1150_p6 }
 0x26c   : > { %p930_p2 = pneg %p929_p1 }
 0x26e   : > { %1056 = dma.done.wait (%p930_p2), %s771_s12, 128  }
 0x26f   : > { %1058 = vsyncadd (%p930_p2), %s771_s12, 4294967168  ;;  %p15_p3 = scmp.ge.s32.totalorder %s1133_s24, 4   ;;  %s1264_s18 = smov %s1065_s19 }
 0x270   : > { %s1265_s19 = smov %s1069_s20  ;;  %s1266_s20 = smov %s1144_s27 }
 0x271   : > { %s1267_s21 = smov %s1133_s24  ;;  %17 = sbr.rel (!%p15_p3) target bundleno = 3 (0x3), region = 78 }
 0x276   :  { %776 = vsyncpa [#allocation3], 1 }
 0x277   :  { %778 = vsyncpa [#allocation3 + $0x1], 1 }

</bundles_post_ra>
